<compile_context>
chip_gen: v7x
topology: tpu7x:2x2x1
jax: 0.10.0
libtpu: 0.0.40
codegen_flags: <defaults>
</compile_context>

<pallas_src>
import functools
import math

import jax
import jax.numpy as jnp
from jax.experimental import pallas as pl
from jax.experimental.pallas import tpu as pltpu

LRELU_SLOPE = 0.1


def _round_up(x, m):
    return ((x + m - 1) // m) * m


@functools.lru_cache(maxsize=None)
def _vmem_limit_bytes():
    """Generation-gated scoped-VMEM limit (v5e/v6e: 128 MiB phys, v7x: 64 MiB)."""
    try:
        cap = getattr(pltpu.get_tpu_info(), "vmem_capacity_bytes", None)
    except Exception:
        cap = None
    if cap is not None and cap >= 100 * 1024 * 1024:
        return 64 * 1024 * 1024
    return 40 * 1024 * 1024


# ----------------------------------------------------------------------------
# Pallas kernels: per-group  out[g] = act(w[g] @ patches[g]^T + bias[g])
#   LHS  w[g]      : (Coutg, Kmat)   (sublane x lane)
#   RHS  patches[g]: (Kmat, M)
#   out            : (Coutg, M)      (Coutg on sublanes, M lane-dense)
# ----------------------------------------------------------------------------
def _mm_kernel_direct(w_ref, p_ref, b_ref, o_ref, *, apply_lrelu):
    """Single k-tile fast path: no scratch accumulator, no zero-init."""
    acc = jnp.dot(w_ref[0], p_ref[0], preferred_element_type=jnp.float32)
    acc = acc + b_ref[0]                       # (TCo, 1) broadcast over lanes
    if apply_lrelu:
        acc = jnp.where(acc >= 0.0, acc, LRELU_SLOPE * acc)
    o_ref[0] = acc.astype(o_ref.dtype)


def _mm_kernel_acc(w_ref, p_ref, b_ref, o_ref, acc_ref, *, apply_lrelu):
    """Multi k-tile path: canonical f32 VMEM accumulator, k innermost/arbitrary."""
    k = pl.program_id(3)

    @pl.when(k == 0)
    def _():
        acc_ref[...] = jnp.zeros_like(acc_ref)

    acc_ref[...] += jnp.dot(w_ref[0], p_ref[0], preferred_element_type=jnp.float32)

    @pl.when(k == pl.num_programs(3) - 1)
    def _():
        acc = acc_ref[...] + b_ref[0]
        if apply_lrelu:
            acc = jnp.where(acc >= 0.0, acc, LRELU_SLOPE * acc)
        o_ref[0] = acc.astype(o_ref.dtype)


def _pick_k_tiling(kp128, cap=2816):
    """Pad K only to a 128 multiple; split into equal 128-multiple tiles if needed."""
    if kp128 <= cap:
        return kp128, 1
    nk = -(-kp128 // cap)
    tk = -(-(kp128 // 128) // nk) * 128
    return tk, nk


def grouped_matmul_bias_act(wT, patches, bias, apply_lrelu, out_dtype):
    """wT: (G, Coutg, Kmat) | patches: (G, Kmat, M) | bias: (G, Coutg)
    -> (G, Coutg, M) in out_dtype."""
    G, Co, Kmat = wT.shape
    _, _, M = patches.shape

    Cop = _round_up(max(Co, 8), 8)
    Kp128 = _round_up(max(Kmat, 128), 128)
    Mp128 = _round_up(max(M, 128), 128)

    TK, nk = _pick_k_tiling(Kp128)
    Kp = TK * nk
    # Full per-group Coutg as one sublane tile -> patches read exactly once.
    TCo = Cop if Cop <= 1024 else 512
    Cop = _round_up(Cop, TCo)
    TM = min(512, Mp128)
    Mp = _round_up(Mp128, TM)

    w = wT.astype(jnp.bfloat16)
    p = patches.astype(jnp.bfloat16)
    if (Cop, Kp) != (Co, Kmat):
        w = jnp.pad(w, ((0, 0), (0, Cop - Co), (0, Kp - Kmat)))
    if (Kp, Mp) != (Kmat, M):
        p = jnp.pad(p, ((0, 0), (0, Kp - Kmat), (0, Mp - M)))
    b = bias.astype(jnp.float32)
    if Cop != Co:
        b = jnp.pad(b, ((0, 0), (0, Cop - Co)))
    b = b[:, :, None]                                              # (G, Cop, 1)

    out_shape = jax.ShapeDtypeStruct((G, Cop, Mp), out_dtype)

    if nk == 1:
        grid = (G, Cop // TCo, Mp // TM)
        out = pl.pallas_call(
            functools.partial(_mm_kernel_direct, apply_lrelu=apply_lrelu),
            out_shape=out_shape,
            grid=grid,
            in_specs=[
                pl.BlockSpec((1, TCo, TK), lambda g, c, m: (g, c, 0)),
                pl.BlockSpec((1, TK, TM), lambda g, c, m: (g, 0, m)),
                pl.BlockSpec((1, TCo, 1), lambda g, c, m: (g, c, 0)),
            ],
            out_specs=pl.BlockSpec((1, TCo, TM), lambda g, c, m: (g, c, m)),
            compiler_params=pltpu.CompilerParams(
                dimension_semantics=("parallel", "parallel", "parallel"),
                vmem_limit_bytes=_vmem_limit_bytes(),
            ),
        )(w, p, b)
    else:
        grid = (G, Cop // TCo, Mp // TM, nk)
        out = pl.pallas_call(
            functools.partial(_mm_kernel_acc, apply_lrelu=apply_lrelu),
            out_shape=out_shape,
            grid=grid,
            in_specs=[
                pl.BlockSpec((1, TCo, TK), lambda g, c, m, k: (g, c, k)),
                pl.BlockSpec((1, TK, TM), lambda g, c, m, k: (g, k, m)),
                pl.BlockSpec((1, TCo, 1), lambda g, c, m, k: (g, c, 0)),
            ],
            out_specs=pl.BlockSpec((1, TCo, TM), lambda g, c, m, k: (g, c, m)),
            scratch_shapes=[pltpu.VMEM((TCo, TM), jnp.float32)],
            compiler_params=pltpu.CompilerParams(
                dimension_semantics=("parallel", "parallel", "parallel", "arbitrary"),
                vmem_limit_bytes=_vmem_limit_bytes(),
            ),
        )(w, p, b)

    if (Cop, Mp) != (Co, M):
        out = out[:, :Co, :M]
    return out


# ----------------------------------------------------------------------------
# Conv glue: channel-first working layout (C, batch, L); im2col in bf16 feeding
# the Pallas grouped matmul.
# ----------------------------------------------------------------------------
def conv1d_cf(x_cf, weight, bias, stride, padding, groups, apply_lrelu, out_dtype):
    """x_cf: (Cin, N, L); weight: (Cout, Cin//groups, K); bias: (Cout,).
    Returns (Cout, N, Lout) in out_dtype."""
    Cin, N, L = x_cf.shape
    Cout, Cg, K = weight.shape
    G = groups
    Cog = Cout // G

    xp = jnp.pad(x_cf, ((0, 0), (0, 0), (padding, padding))).astype(jnp.bfloat16)
    Lp = L + 2 * padding
    Lout = (Lp - K) // stride + 1

    # idx[k, m] = m*stride + k   (K placed before Lout -> cheaper transpose below)
    idx = jnp.arange(K)[:, None] + jnp.arange(Lout)[None, :] * stride     # (K, Lout)

    xg = xp.reshape(G, Cg, N, Lp)
    pat = xg[:, :, :, idx]                                     # (G, Cg, N, K, Lout)
    pat = jnp.transpose(pat, (0, 1, 3, 2, 4)).reshape(G, Cg * K, N * Lout)

    wT = weight.reshape(G, Cog, Cg * K).astype(jnp.bfloat16)   # rows match (cg, k)
    bg = bias.reshape(G, Cog).astype(jnp.float32)

    o = grouped_matmul_bias_act(wT, pat, bg, apply_lrelu, out_dtype)  # (G, Cog, N*Lout)
    return o.reshape(Cout, N, Lout)


def conv2d_k1_cf(x_cf, weight, bias, stride, padding, apply_lrelu, out_dtype):
    """Conv2d with kernel (k,1) expressed as conv1d along H.
    x_cf: (Cin, B*W, H); weight: (Cout, Cin, k, 1)."""
    return conv1d_cf(x_cf, weight[:, :, :, 0], bias, stride, padding, 1,
                     apply_lrelu, out_dtype)


def avg_pool1d_4_2_2(x):
    """AvgPool1d(kernel=4, stride=2, padding=2), count_include_pad=True.
    Four shifted adds * 0.25 on the VPU -- no MXU, no im2col."""
    B, C, L = x.shape
    xp = jnp.pad(x, ((0, 0), (0, 0), (2, 2)))
    Lout = (L + 2 * 2 - 4) // 2 + 1
    taps = [xp[:, :, k:k + 2 * Lout:2] for k in range(4)]
    return 0.25 * (taps[0] + taps[1] + taps[2] + taps[3])


# ----------------------------------------------------------------------------
# Discriminator forwards
# ----------------------------------------------------------------------------
def disc_p_forward(params, x):
    """DiscriminatorP. x: (B, 1, T)."""
    period = params["period"]
    B, C, T = x.shape
    if T % period != 0:
        n_pad = period - T % period
        x = jnp.pad(x, ((0, 0), (0, 0), (0, n_pad)), mode="reflect")
        T = T + n_pad
    H, W = T // period, period
    x4 = x.reshape(B, C, H, W)
    # channel-first working layout: (C, B*W, H)
    xw = jnp.transpose(x4, (1, 0, 3, 2)).reshape(C, B * W, H)

    fmap = []
    for (w, b, stride) in params["convs"]:
        xw = conv2d_k1_cf(xw, w, b, stride, padding=2, apply_lrelu=True,
                          out_dtype=jnp.bfloat16)
        Cc, _, Hc = xw.shape
        fmap.append(jnp.transpose(xw.reshape(Cc, B, W, Hc), (1, 0, 3, 2)))
    wp, bp = params["conv_post"]
    xw = conv2d_k1_cf(xw, wp, bp, 1, padding=1, apply_lrelu=False,
                      out_dtype=jnp.float32)
    Cc, _, Hc = xw.shape
    xout = jnp.transpose(xw.reshape(Cc, B, W, Hc), (1, 0, 3, 2))   # (B, 1, Hc, W)
    fmap.append(xout)
    logit = xout.reshape(B, -1)
    return logit, fmap


def disc_s_forward(params, x):
    """DiscriminatorS. x: (B, 1, L)."""
    B = x.shape[0]
    xw = jnp.transpose(x, (1, 0, 2))                                # (1, B, L)
    fmap = []
    for (w, b, stride, pad, groups) in params["convs"]:
        xw = conv1d_cf(xw, w, b, stride, pad, groups, True, jnp.bfloat16)
        fmap.append(jnp.transpose(xw, (1, 0, 2)))
    wp, bp = params["conv_post"]
    xw = conv1d_cf(xw, wp, bp, 1, 1, 1, False, jnp.float32)
    xo = jnp.transpose(xw, (1, 0, 2))                               # (B, 1, Lout)
    fmap.append(xo)
    logit = xo.reshape(B, -1)
    return logit, fmap


def mpdmsd_forward(params, spec, wav):
    """Matches MPDMSD.forward: logits/fmaps from MPD (5 discs) then MSD (3 discs)."""
    del spec  # spec is an unused argument in the reference forward
    logit_wav, feat_wav = [], []
    # MPD
    for d in params["mpd"]:
        logit, fmap = disc_p_forward(d, wav)
        logit_wav.append(logit)
        feat_wav.append(fmap)
    # MSD (mean-pools the waveform before discriminators 1 and 2)
    y = wav
    for i, d in enumerate(params["msd"]):
        if i != 0:
            y = avg_pool1d_4_2_2(y)
        logit, fmap = disc_s_forward(d, y)
        logit_wav.append(logit)
        feat_wav.append(fmap)
    return logit_wav, feat_wav


# ----------------------------------------------------------------------------
# Deterministic parameter init (weight_norm at init => w == v, so plain weights)
# ----------------------------------------------------------------------------
def _init_conv(key, cout, cin_g, ksize):
    wkey, bkey = jax.random.split(key)
    fan_in = cin_g * int(math.prod(ksize))
    bound = 1.0 / math.sqrt(fan_in)
    w = jax.random.uniform(wkey, (cout, cin_g) + tuple(ksize), jnp.float32, -bound, bound)
    b = jax.random.uniform(bkey, (cout,), jnp.float32, -bound, bound)
    return w, b


def build_params(key):
    mpd_key, msd_key = jax.random.split(key)

    # ---- MPD: DiscriminatorP(period) for periods 2,3,5,7,11 ----
    mpd = []
    for pi, period in enumerate([2, 3, 5, 7, 11]):
        dk = jax.random.fold_in(mpd_key, pi)
        cfg = [(1, 32, 3), (32, 128, 3), (128, 512, 3), (512, 1024, 3), (1024, 1024, 1)]
        convs = []
        for li, (cin, cout, stride) in enumerate(cfg):
            w, b = _init_conv(jax.random.fold_in(dk, li), cout, cin, (5, 1))
            convs.append((w, b, stride))
        wp, bp = _init_conv(jax.random.fold_in(dk, 100), 1, 1024, (3, 1))
        mpd.append({"period": period, "convs": convs, "conv_post": (wp, bp)})

    # ---- MSD: 3 x DiscriminatorS ----
    cfg = [
        (1, 128, 15, 1, 7, 1),
        (128, 128, 41, 2, 20, 4),
        (128, 256, 41, 2, 20, 16),
        (256, 512, 41, 4, 20, 16),
        (512, 1024, 41, 4, 20, 16),
        (1024, 1024, 41, 1, 20, 16),
        (1024, 1024, 5, 1, 2, 1),
    ]
    msd = []
    for di in range(3):
        dk = jax.random.fold_in(msd_key, di)
        convs = []
        for li, (cin, cout, ksz, stride, pad, groups) in enumerate(cfg):
            w, b = _init_conv(jax.random.fold_in(dk, li), cout, cin // groups, (ksz,))
            convs.append((w, b, stride, pad, groups))
        wp, bp = _init_conv(jax.random.fold_in(dk, 100), 1, 1024, (3,))
        msd.append({"convs": convs, "conv_post": (wp, bp)})

    return {"mpd": mpd, "msd": msd}


# ----------------------------------------------------------------------------
if __name__ == "__main__":
    key = jax.random.PRNGKey(0)
    k_spec, k_wav, k_param = jax.random.split(key, 3)

    # small shapes: batch=2, wav length T=64 (spec is unused by the forward)
    spec = jax.random.normal(k_spec, (2, 2, 16, 9), jnp.float32)
    wav = jax.random.normal(k_wav, (2, 1, 64), jnp.float32)

    params = build_params(k_param)

    logits, fmaps = mpdmsd_forward(params, spec, wav)
    jax.block_until_ready((logits, fmaps))

    assert len(logits) == 8 and len(fmaps) == 8
    assert all(f is not None for fm in fmaps for f in fm)
    print("KERNEL_OK")
</pallas_src>

<mosaic_0001>
module attributes {stable_mosaic.version = 11 : i64} {
  func.func @_mm_kernel_direct(%arg0: i32, %arg1: i32, %arg2: i32, %arg3: memref<1x32x128xbf16, #tpu.memory_space<vmem>>, %arg4: memref<1x128x128xbf16, #tpu.memory_space<vmem>>, %arg5: memref<1x32x1xf32, #tpu.memory_space<vmem>>, %arg6: memref<1x32x128xbf16, #tpu.memory_space<vmem>>) attributes {dimension_semantics = [#tpu.dimension_semantics<parallel>, #tpu.dimension_semantics<parallel>, #tpu.dimension_semantics<parallel>], iteration_bounds = array<i64: 1, 1, 1>, scalar_prefetch = 0 : i64, scratch_operands = 0 : i64, tpu.core_type = #tpu.core_type<tc>, window_params = [{transform_indices = @transform_0, window_bounds = array<i64: 1, 32, 128>}, {transform_indices = @transform_1, window_bounds = array<i64: 1, 128, 128>}, {transform_indices = @transform_2, window_bounds = array<i64: 1, 32, 1>}, {transform_indices = @transform_3, window_bounds = array<i64: 1, 32, 128>}]} {
    %c0 = arith.constant 0 : index
    %c0_0 = arith.constant 0 : index
    %c0_1 = arith.constant 0 : index
    %0 = vector.load %arg3[%c0, %c0_0, %c0_1] : memref<1x32x128xbf16, #tpu.memory_space<vmem>>, vector<1x32x128xbf16>
    %1 = vector.shape_cast %0 : vector<1x32x128xbf16> to vector<32x128xbf16>
    %c0_2 = arith.constant 0 : index
    %c0_3 = arith.constant 0 : index
    %c0_4 = arith.constant 0 : index
    %2 = vector.load %arg4[%c0_2, %c0_3, %c0_4] : memref<1x128x128xbf16, #tpu.memory_space<vmem>>, vector<1x128x128xbf16>
    %3 = vector.shape_cast %2 : vector<1x128x128xbf16> to vector<128x128xbf16>
    %cst = arith.constant dense<0.000000e+00> : vector<32x128xf32>
    %4 = tpu.matmul %1, %3, %cst {dimension_numbers = #tpu.dot_dimension_numbers<[1], [0], [0], [1], [0, 0, 1, 1], [], []>} : vector<32x128xbf16>, vector<128x128xbf16>, vector<32x128xf32> -> vector<32x128xf32>
    %c0_5 = arith.constant 0 : index
    %c0_6 = arith.constant 0 : index
    %c0_7 = arith.constant 0 : index
    %5 = vector.load %arg5[%c0_5, %c0_6, %c0_7] : memref<1x32x1xf32, #tpu.memory_space<vmem>>, vector<1x32x1xf32>
    %6 = vector.shape_cast %5 : vector<1x32x1xf32> to vector<32x1xf32>
    %7 = vector.broadcast %6 : vector<32x1xf32> to vector<32x128xf32>
    %8 = arith.addf %4, %7 : vector<32x128xf32>
    %cst_8 = arith.constant 0.000000e+00 : f32
    %9 = vector.broadcast %cst_8 : f32 to vector<32x128xf32>
    %10 = arith.cmpf oge, %8, %9 : vector<32x128xf32>
    %cst_9 = arith.constant 1.000000e-01 : f32
    %11 = vector.broadcast %cst_9 : f32 to vector<32x128xf32>
    %12 = arith.mulf %11, %8 : vector<32x128xf32>
    %13 = arith.select %10, %8, %12 : vector<32x128xi1>, vector<32x128xf32>
    %14 = arith.truncf %13 : vector<32x128xf32> to vector<32x128xbf16>
    %c0_10 = arith.constant 0 : index
    %c0_11 = arith.constant 0 : index
    %c0_12 = arith.constant 0 : index
    %15 = vector.load %arg6[%c0_10, %c0_11, %c0_12] : memref<1x32x128xbf16, #tpu.memory_space<vmem>>, vector<1x32x128xbf16>
    %16 = vector.shape_cast %15 : vector<1x32x128xbf16> to vector<32x128xbf16>
    %17 = vector.shape_cast %14 : vector<32x128xbf16> to vector<1x32x128xbf16>
    tpu.vector_store %arg6[%c0_10, %c0_11, %c0_12], %17 {strides = array<i32>} : memref<1x32x128xbf16, #tpu.memory_space<vmem>>, vector<1x32x128xbf16>,
    return
  }
  func.func @transform_0(%arg0: i32, %arg1: i32, %arg2: i32) -> (i32, i32, i32) {
    %c0_i32 = arith.constant 0 : i32
    %c0_i32_0 = arith.constant 0 : i32
    return %arg0, %arg1, %c0_i32 : i32, i32, i32
  }
  func.func @transform_1(%arg0: i32, %arg1: i32, %arg2: i32) -> (i32, i32, i32) {
    %c0_i32 = arith.constant 0 : i32
    %c0_i32_0 = arith.constant 0 : i32
    return %arg0, %c0_i32, %arg2 : i32, i32, i32
  }
  func.func @transform_2(%arg0: i32, %arg1: i32, %arg2: i32) -> (i32, i32, i32) {
    %c0_i32 = arith.constant 0 : i32
    %c0_i32_0 = arith.constant 0 : i32
    return %arg0, %arg1, %c0_i32 : i32, i32, i32
  }
  func.func @transform_3(%arg0: i32, %arg1: i32, %arg2: i32) -> (i32, i32, i32) {
    %c0_i32 = arith.constant 0 : i32
    return %arg0, %arg1, %arg2 : i32, i32, i32
  }
}

</mosaic_0001>

<bundles_post_ra>
// kernel: tpu_custom_call.1
= control target key start
LH: loop header
LB: loop body
LE: loop exit
PB: predicated region body
PF: predicated region fallthrough
CT: control target
= control target key end

     0   :  { %8 = vsyncpa [#allocation3], 0  ;;  %s429_s0 = inlined_call_operand.vmem [shape: bf16[1,32,128], index: 0, kind: input, shape index: {}]   ;;  %s430_s1 = inlined_call_operand.hbm [shape: bf16[1,128,128], index: 1, kind: input, shape index: {}]   ;;  %s431_s2 = inlined_call_operand.vmem [shape: f32[1,32,1], index: 2, kind: input, shape index: {}]   ;;  %s432_s3 = inlined_call_operand.hbm [shape: bf16[1,32,128], index: 3, kind: output, shape index: {}]  }
   0x1   :  { %9 = vsyncpa [#allocation4], 0  ;;  %s356_s12 = smov [#allocation2]   ;;  %s308_s16 = scalar_lea.hbm %s430_s1, 1024 }
   0x2   :  { %s17_s13 = sshll.u32 %s356_s12, 4  ;;  %p309_p0 = scmp.ne.s32.totalorder %s430_s1, %s308_s16  ;;  %s18_s13 = int_to_ptr.vmem [resolvable:$true] %s17_s13 }
   0x3   :  { %p312_p1 = scmp.lt.u32.totalorder %s308_s16, %s430_s1 }
   0x5   :  { %p314_p2 = pnand %p312_p1, %p309_p0 }
   0x7   :  { %317 = shalt.err (!%p314_p2)
}
   0x8   :  { %s318_s21 = scalar_lea.vmem %s18_s13, 1024  ;;  %p323_p4 = scmp.lt.s32.totalorder %s18_s13, %s18_s13 }
   0x9   :  { %p319_p3 = scmp.ne.s32.totalorder %s18_s13, %s318_s21  ;;  %p324_p5 = scmp.lt.s32.totalorder %s318_s21, %s318_s21 }
   0xb   :  { %p325_p6 = por %p324_p5, %p323_p4 }
   0xd   :  { %p326_p7 = pnand %p325_p6, %p319_p3 }
   0xf   :  { %329 = shalt.err (!%p326_p7)
}
  0x10   :  { %s357_s22 = smov 64   ;;  %s358_s23 = smov 4  }
  0x11   :  { %23 = dma.hbm_to_vmem [thread:$0]  %s430_s1, 1024, %s18_s13, [#allocation3], %s357_s22, %s357_s22, %s358_s23  }
  0x12   :  { %352 = dma.done.wait [#allocation3], 1024  }
  0x13   :  { %353 = vsyncadd [#allocation3], 4294966272  ;;  %v359_v0 = vmov 0   ;;  %v298_v1 = vld [vmem:[#allocation2] sm:$0xff]   ;;  %v299_v2 = vld [vmem:[#allocation2 + $0x8] sm:$0xff]  }
  0x14   :  { %297 = vset.pattern.permute.xlu1 %v359_v0  ;;  %296 = vset.pattern.permute.xlu0 %v359_v0  ;;  %v300_v3 = vld [vmem:[#allocation2 + $0x10] sm:$0xff]   ;;  %v301_v4 = vld [vmem:[#allocation2 + $0x18] sm:$0xff]   ;;  %v306_v5 = vld [vmem:[%s429_s0] sm:$0xff]  }
  0x15   :  { %271 = vmatprep.subr.bf16.mxu0 %v298_v1  ;;  %287 = vmatprep.mubr.bf16.mxu0 %v306_v5  ;;  %v52_v6 = vld [vmem:[%s431_s2 + $0x10] sm:$0xff]  ;;  %v50_v7 = vld [vmem:[%s431_s2] sm:$0xff]  ;;  %v53_v9 = vld [vmem:[%s431_s2 + $0x18] sm:$0xff] }
  0x16   :  { %272 = vmatpush3.bf16.msra.mxu0 %v298_v1  ;;  %66 = vperm.xlu1 %297, %v52_v6   ;;  %v302_v8 = vld [vmem:[#allocation2 + $0x20] sm:$0xff]   ;;  %v51_v10 = vld [vmem:[%s431_s2 + $0x8] sm:$0xff]  ;;  %v304_v12 = vld [vmem:[#allocation2 + $0x30] sm:$0xff]  }
  0x17   :  { %273 = vmatprep.subr.bf16.mxu0 %v299_v2  ;;  %56 = vperm.xlu0 %296, %v50_v7   ;;  %v303_v11 = vld [vmem:[#allocation2 + $0x28] sm:$0xff]   ;;  %v305_v13 = vld [vmem:[#allocation2 + $0x38] sm:$0xff]  }
  0x18   :  { %v307_v14 = vld [vmem:[%s429_s0 + $0x8] sm:$0xff]   ;;  %s360_s0 = smov [#allocation5]  }
  0x19   :  { %s220_s2 = sshll.u32 %s360_s0, 4  ;;  %s221_s2 = int_to_ptr.vmem [resolvable:$true] %s220_s2 }
  0x1a   :  { %274 = vmatpush3.bf16.msra.mxu0 %v299_v2  ;;  %71 = vperm.xlu1 %297, %v53_v9   ;;  %s330_s10 = scalar_lea.vmem %s221_s2, 256  ;;  %p335_p9 = scmp.lt.s32.totalorder %s221_s2, %s221_s2 }
  0x1b   :  { %275 = vmatprep.subr.bf16.mxu0 %v300_v3  ;;  %61 = vperm.xlu0 %296, %v51_v10   ;;  %p331_p8 = scmp.ne.s32.totalorder %s221_s2, %s330_s10  ;;  %p336_p10 = scmp.lt.s32.totalorder %s330_s10, %s330_s10 }
  0x1d   :  { %p337_p11 = por %p336_p10, %p335_p9 }
  0x1e   :  { %276 = vmatpush3.bf16.msra.mxu0 %v300_v3 }
  0x1f   :  { %277 = vmatprep.subr.bf16.mxu0 %v301_v4  ;;  %p338_p12 = pnand %p337_p11, %p331_p8 }
  0x22   :  { %278 = vmatpush3.bf16.msra.mxu0 %v301_v4 }
  0x23   :  { %279 = vmatprep.subr.bf16.mxu0 %v302_v8 }
  0x26   :  { %280 = vmatpush3.bf16.msra.mxu0 %v302_v8 }
  0x27   :  { %281 = vmatprep.subr.bf16.mxu0 %v303_v11 }
  0x2a   :  { %282 = vmatpush3.bf16.msra.mxu0 %v303_v11 }
  0x2b   :  { %283 = vmatprep.subr.bf16.mxu0 %v304_v12 }
  0x2e   :  { %284 = vmatpush3.bf16.msra.mxu0 %v304_v12 }
  0x2f   :  { %285 = vmatprep.subr.bf16.mxu0 %v305_v13 }
  0x32   :  { %286 = vmatpush3.bf16.msra.mxu0 %v305_v13 }
  0x35   :  { %288 = vmatmul.mubr.bf16.vlgmr.msra.gmra.mrb[0].mxu0 %v307_v14 }
  0x95   :  { %v67_v15 = vpop.permute.xlu1 %66 }
  0x96   :  { %v57_v16 = vpop.permute.xlu0 %56 }
  0x99   :  { %v72_v20 = vpop.permute.xlu1 %71 }
  0x9a   :  { %v62_v23 = vpop.permute.xlu0 %61 }
 0x108   :  { %v289_v17 = vpop.f32.mrb[0].mxu0 }
 0x109   :  { %v177_v18 = vadd.f32 %v289_v17, %v67_v15  ;;  %v168_v19 = vpop.f32.mrb[1].mxu0 }
 0x10a   :  { %v169_v21 = vadd.f32 %v168_v19, %v57_v16  ;;  %v290_v22 = vpop.f32.mrb[2].mxu0 }
 0x10b   :  { %v189_v24 = vmul.f32 0.1, %v177_v18  ;;  %v180_v25 = vadd.f32 %v290_v22, %v72_v20  ;;  %v171_v26 = vpop.f32.mrb[3].mxu0  ;;  %vm185_vm0 = vcmp.ge.f32.partialorder %v177_v18, 0.0 }
 0x10c   :  { %v187_v27 = vmul.f32 0.1, %v169_v21  ;;  %v172_v28 = vadd.f32 %v171_v26, %v62_v23  ;;  %vm183_vm1 = vcmp.ge.f32.partialorder %v169_v21, 0.0 }
 0x10d   :  { %vm186_vm2 = vcmp.ge.f32.partialorder %v180_v25, 0.0  ;;  %v190_v29 = vmul.f32 0.1, %v180_v25  ;;  %v193_v31 = vsel %vm185_vm0, %v177_v18, %v189_v24 }
 0x10e   :  { %vm184_vm3 = vcmp.ge.f32.partialorder %v172_v28, 0.0  ;;  %v188_v30 = vmul.f32 0.1, %v172_v28  ;;  %v191_v33 = vsel %vm183_vm1, %v169_v21, %v187_v27 }
 0x10f   :  { %v194_v32 = vsel %vm186_vm2, %v180_v25, %v190_v29 }
 0x110   :  { %v192_v34 = vsel %vm184_vm3, %v172_v28, %v188_v30  ;;  %v258_v35 = vpack.c.bf16 %v194_v32, %v193_v31 }
 0x111   :  { %v253_v36 = vpack.c.bf16 %v192_v34, %v191_v33 }
 0x112   :  { %260 = vst [vmem:[#allocation5 + $0x8] sm:$0xff] %v258_v35  }
 0x113   :  { %254 = vst [vmem:[#allocation5] sm:$0xff] %v253_v36  }
 0x114   :  { %341 = shalt.err (!%p338_p12)
}
 0x115   :  { %s342_s13 = scalar_lea.hbm %s432_s3, 256 }
 0x116   :  { %p343_p13 = scmp.ne.s32.totalorder %s432_s3, %s342_s13  ;;  %p346_p0 = scmp.lt.u32.totalorder %s342_s13, %s432_s3 }
 0x118   :  { %p348_p1 = pnand %p346_p0, %p343_p13 }
 0x11a   :  { %351 = shalt.err (!%p348_p1)
}
 0x11b   :  { %226 = dma.vmem_to_hbm [thread:$0]  %s221_s2, 256, %s432_s3, [#allocation4], %s357_s22, %s357_s22, %s358_s23  }
 0x11c   :  { %354 = dma.done.wait [#allocation4], 256  }
 0x11d   :  { %355 = vsyncadd [#allocation4], 4294967040 }
 0x11e   :  { %230 = vsyncpa [#allocation3], 1 }
 0x11f   :  { %231 = vsyncpa [#allocation4], 1 }

</bundles_post_ra>
